<compile_context>
chip_gen: v7x
topology: tpu7x:2x2x1
jax: 0.10.0
libtpu: 0.0.40
codegen_flags: <defaults>
</compile_context>

<pallas_src>
import jax
import jax.numpy as jnp
from jax.experimental import pallas as pl
from jax.experimental.pallas import tpu as pltpu


def _round_up(x: int, m: int) -> int:
    return ((x + m - 1) // m) * m


def _log_softmax_kernel(x_ref, o_ref):
    # Block: (tR, V). Stable log-softmax over the last (lane) axis.
    # Reductions in f32; x_ref is re-read for the final subtraction so the f32
    # upcast of the tile is not live across the whole body.
    x32 = x_ref[...].astype(jnp.float32)
    m = jnp.max(x32, axis=-1, keepdims=True)
    lse = m + jnp.log(jnp.sum(jnp.exp(x32 - m), axis=-1, keepdims=True))
    o_ref[...] = (x_ref[...].astype(jnp.float32) - lse).astype(o_ref.dtype)


def _vmem_limit_bytes() -> int:
    # Per-generation VMEM: v5e/v6e = 128 MiB, v7x = 64 MiB per TensorCore.
    # Use ~75% of physical capacity (capped at 96 MiB) so large tiles compile on
    # every generation without relying on the 16/32 MiB scoped defaults.
    try:
        cap = int(pltpu.get_tpu_info().vmem_capacity_bytes)
    except Exception:
        cap = 64 << 20  # conservative fallback: v7x per-core VMEM
    return int(min((cap * 3) // 4, 96 << 20))


def _choose_tile_rows(R: int, V: int, itemsize: int, vmem_limit: int) -> int:
    # Minimum sublane tile depends on dtype packing: f32 -> 8, bf16/f16 -> 16, 8-bit -> 32.
    row_align = max(8, 32 // itemsize)
    # Per-row VMEM footprint: double-buffered in + out tiles (native dtype) plus
    # ~2 tile-sized f32 temporaries inside the body.
    bytes_per_row = V * (4 * itemsize + 8)
    budget = (vmem_limit * 3) // 5  # headroom for compiler-internal scratch
    tR = max(row_align, (budget // bytes_per_row) // row_align * row_align)
    # Keep >= 4 grid steps when there are enough rows: feeds both v7x TensorCores
    # and keeps the DMA pipeline overlapped even for small ASR batches.
    if R > row_align:
        tR = min(tR, _round_up(pl.cdiv(R, 4), row_align))
    if tR >= R:
        tR = R  # single full block; block dim == full array dim is always legal
    return int(tR)


def functional_module_forward(x):
    """Pallas implementation of FunctionalModule(log_softmax(dim=-1)).forward(x).

    x: (..., V) float array (f32 or bf16). Returns array of same shape/dtype.
    """
    orig_shape = x.shape
    dtype = x.dtype
    V = int(orig_shape[-1])
    R = 1
    for d in orig_shape[:-1]:
        R *= int(d)
    x2 = x.reshape(R, V)

    itemsize = jnp.dtype(dtype).itemsize
    vmem_limit = _vmem_limit_bytes()
    tR = _choose_tile_rows(R, V, itemsize, vmem_limit)
    grid = (pl.cdiv(R, tR),)

    cost = pl.CostEstimate(
        flops=5 * R * V,                      # max, sub, add (sum), sub, misc
        transcendentals=R * V + R,            # exp per element + log per row
        bytes_accessed=2 * R * V * itemsize,  # one read + one write of the tensor
    )

    out = pl.pallas_call(
        _log_softmax_kernel,
        out_shape=jax.ShapeDtypeStruct((R, V), dtype),
        grid_spec=pl.GridSpec(
            grid=grid,
            in_specs=[pl.BlockSpec((tR, V), lambda i: (i, 0))],
            out_specs=pl.BlockSpec((tR, V), lambda i: (i, 0)),
        ),
        compiler_params=pltpu.CompilerParams(
            dimension_semantics=("parallel",),
            vmem_limit_bytes=vmem_limit,
        ),
        cost_estimate=cost,
    )(x2)
    return out.reshape(orig_shape)


if __name__ == "__main__":
    key = jax.random.PRNGKey(0)

    # 1) Small ASR-emission-like shape (batch, time, vocab), f32 — tiny V, no padding anywhere.
    B, T, V = 2, 8, 32
    x = jax.random.normal(key, (B, T, V), dtype=jnp.float32)
    out = jax.block_until_ready(functional_module_forward(x))
    ref = jax.nn.log_softmax(x, axis=-1)
    assert out.shape == x.shape and out.dtype == x.dtype
    assert jnp.max(jnp.abs(out - ref)) < 1e-5

    # 2) Shape with ragged rows and a non-128-multiple vocab, f32 (exercises in-kernel masking).
    k2 = jax.random.PRNGKey(1)
    x2 = jax.random.normal(k2, (2, 13, 200), dtype=jnp.float32)
    out2 = jax.block_until_ready(functional_module_forward(x2))
    ref2 = jax.nn.log_softmax(x2, axis=-1)
    assert out2.shape == x2.shape and out2.dtype == x2.dtype
    assert jnp.max(jnp.abs(out2 - ref2)) < 1e-5

    # 3) bf16 I/O path (halved HBM traffic; f32 internal reduction).
    xb = x.astype(jnp.bfloat16)
    outb = jax.block_until_ready(functional_module_forward(xb))
    refb = jax.nn.log_softmax(xb.astype(jnp.float32), axis=-1)
    assert outb.shape == xb.shape and outb.dtype == xb.dtype
    assert jnp.max(jnp.abs(outb.astype(jnp.float32) - refb)) < 5e-2

    print("KERNEL_OK")
</pallas_src>

<mosaic_0001>
module attributes {stable_mosaic.version = 11 : i64} {
  func.func @_log_softmax_kernel(%arg0: i32, %arg1: memref<8x32xf32, #tpu.memory_space<vmem>>, %arg2: memref<8x32xf32, #tpu.memory_space<vmem>>) attributes {dimension_semantics = [#tpu.dimension_semantics<parallel>], iteration_bounds = array<i64: 2>, scalar_prefetch = 0 : i64, scratch_operands = 0 : i64, tpu.core_type = #tpu.core_type<tc>, window_params = [{transform_indices = @transform_0, window_bounds = array<i64: 8, 32>}, {transform_indices = @transform_1, window_bounds = array<i64: 8, 32>}]} {
    %c0 = arith.constant 0 : index
    %c0_0 = arith.constant 0 : index
    %0 = vector.load %arg1[%c0, %c0_0] : memref<8x32xf32, #tpu.memory_space<vmem>>, vector<8x32xf32>
    %cst = arith.constant dense<0xFF800000> : vector<8xf32>
    %1 = vector.multi_reduction <maximumf>, %0, %cst [1] : vector<8x32xf32> to vector<8xf32>
    %2 = vector.shape_cast %1 : vector<8xf32> to vector<8x1xf32>
    %3 = vector.broadcast %2 : vector<8x1xf32> to vector<8x32xf32>
    %4 = arith.subf %0, %3 : vector<8x32xf32>
    %5 = math.exp %4 : vector<8x32xf32>
    %cst_1 = arith.constant dense<0.000000e+00> : vector<8xf32>
    %6 = vector.multi_reduction <add>, %5, %cst_1 [1] : vector<8x32xf32> to vector<8xf32>
    %7 = vector.shape_cast %6 : vector<8xf32> to vector<8x1xf32>
    %8 = math.log %7 : vector<8x1xf32>
    %9 = arith.addf %2, %8 : vector<8x1xf32>
    %c0_2 = arith.constant 0 : index
    %c0_3 = arith.constant 0 : index
    %10 = vector.load %arg1[%c0_2, %c0_3] : memref<8x32xf32, #tpu.memory_space<vmem>>, vector<8x32xf32>
    %11 = vector.broadcast %9 : vector<8x1xf32> to vector<8x32xf32>
    %12 = arith.subf %10, %11 : vector<8x32xf32>
    %c0_4 = arith.constant 0 : index
    %c0_5 = arith.constant 0 : index
    %13 = vector.load %arg2[%c0_4, %c0_5] : memref<8x32xf32, #tpu.memory_space<vmem>>, vector<8x32xf32>
    tpu.vector_store %arg2[%c0_4, %c0_5], %12 {strides = array<i32>} : memref<8x32xf32, #tpu.memory_space<vmem>>, vector<8x32xf32>,
    return
  }
  func.func @transform_0(%arg0: i32) -> (i32, i32) {
    %c0_i32 = arith.constant 0 : i32
    %c0_i32_0 = arith.constant 0 : i32
    return %arg0, %c0_i32 : i32, i32
  }
  func.func @transform_1(%arg0: i32) -> (i32, i32) {
    %c0_i32 = arith.constant 0 : i32
    %c0_i32_0 = arith.constant 0 : i32
    return %arg0, %c0_i32 : i32, i32
  }
}

</mosaic_0001>

<bundles_post_ra>
// kernel: tpu_custom_call.1
= control target key start
LH: loop header
LB: loop body
LE: loop exit
PB: predicated region body
PF: predicated region fallthrough
CT: control target
= control target key end

     0   :  { %6 = vsyncpa [#allocation3], 0  ;;  %s568_s0 = inlined_call_operand.hbm [shape: f32[16,32], index: 0, kind: input, shape index: {}]   ;;  %s569_s1 = inlined_call_operand.hbm [shape: f32[16,32], index: 1, kind: output, shape index: {}]  }
   0x1   :  { %8 = vsyncpa [#allocation3 + $0x1], 0 }
   0x2   :  { %9 = vsyncpa [#allocation4], 0 }
   0x3   :  { %11 = vsyncpa [#allocation4 + $0x1], 0  ;;  %s404_s6 = smov 0   ;;  %s406_s7 = smov 0  }
   0x4   :  { %s408_s8 = smov 0   ;;  %s410_s9 = smov 0  }
   0x5 LB: > { %s425_s10 = sadd.s32 4294967295, %s390_s9   ;;  %s232_s11 = sadd.s32 4294967294, %s390_s9   ;;  %s390_s9 = sphi %s410_s9, %s584_s9   ;;  %s386_s8 = sphi %s408_s8, %s583_s8   ;;  %s382_s7 = sphi %s406_s7, %s582_s7   ;;  %s378_s6 = sphi %s404_s6, %s581_s6  }
   0x6   : > { %s429_s12 = sadd.s32 1, %s390_s9   ;;  %s24_s13 = sadd.s32 1, %s386_s8 }
   0x7   : > { %s21_s14 = ssub.s32 %s390_s9, %s429_s12  ;;  %p31_p0 = scmp.ne.s32.totalorder %s386_s8, %s382_s7 }
   0x8   : > { %p22_p1 = scmp.eq.s32.totalorder %s21_s14, 0  ;;  %p32_p2 = scmp.eq.s32.totalorder %s390_s9, 0 }
   0x9   : > { %p37_p3 = scmp.ne.s32.totalorder %s382_s7, %s378_s6  ;;  %p38_p4 = scmp.eq.s32.totalorder %s425_s10, 0 }
   0xa   : > { %s441_s15 = scalar_select %p22_p1, %s386_s8, %s24_s13  }
   0xb   : > { %p443_p5 = por %p32_p2, %p31_p0  ;;  %p447_p6 = por %p38_p4, %p37_p3 }
   0xc   : > { %p61_p7 = scmp.eq.s32.totalorder %s425_s10, 1  ;;  %p67_p8 = scmp.eq.s32.totalorder %s232_s11, 1 }
   0xd   : > { %p256_p10 = scmp.lt.s32.totalorder %s390_s9, 2  ;;  %s87_s20 = sand.u32 1, %s386_s8  }
   0xe   : > { %p454_p11 = por %p61_p7, %p31_p0  ;;  %p458_p12 = por %p67_p8, %p37_p3 }
   0xf   : > { %s236_s21 = sshll.u32 %s390_s9, 7  ;;  %s235_s22 = sshll.u32 %s87_s20, 3 }
  0x10   : > { %s573_s18 = scalar_select %p454_p11, 1, 0 }
  0x11   : > { %s574_s19 = scalar_select %p458_p12, 1, 0 }
  0x12   : > { %s467_s25 = scalar_lea.hbm %s568_s0, %s236_s21  ;;  %s91_s26 = scalar_lea.vmem [#allocation2], %s235_s22 }
  0x13   : > { %s98_s27 = sshll.u32 %s91_s26, 4  ;;  %p471_p13 = pnand %p256_p10, %p443_p5  ;;  %s475_s27 = int_to_ptr.vmem [resolvable:$true] %s98_s27 }
  0x14   : > { %s88_s29 = scalar_lea.sflag [#allocation3], %s87_s20  ;;  %s294_s30 = scalar_lea.hbm %s467_s25, 128 }
  0x15   : > { %p295_p2 = scmp.ne.s32.totalorder %s467_s25, %s294_s30  ;;  %p296_p3 = pneg %p471_p13 }
  0x16   : > { %s299_s4 = scalar_lea.hbm %s568_s0, 256  ;;  %p300_p5 = scmp.lt.u32.totalorder %s467_s25, %s568_s0 }
  0x17   : > { %p297_p4 = pnand %p296_p3, %p295_p2  ;;  %p301_p8 = scmp.lt.u32.totalorder %s299_s4, %s294_s30 }
  0x18   : > { %p303_p9 = scmp.lt.u32.totalorder %s294_s30, %s467_s25 }
  0x19   : > { %p298_p7 = pneg %p297_p4  ;;  %p302_p10 = por %p301_p8, %p300_p5 }
  0x1b   : > { %p304_p0 = por %p303_p9, %p302_p10 }
  0x1d   : > { %p305_p1 = pnand %p304_p0, %p298_p7 }
  0x1f   : > { %308 = shalt.err (!%p305_p1)
}
  0x20   : > { %s309_s13 = scalar_lea.vmem %s475_s27, 128  ;;  %s392_s14 = smov [#allocation2]  }
  0x21   : > { %p310_p2 = scmp.ne.s32.totalorder %s475_s27, %s309_s13  ;;  %s314_s16 = sshll.u32 %s392_s14, 4  ;;  %s315_s16 = int_to_ptr.vmem [resolvable:$false] %s314_s16 }
  0x22   : > { %s316_s20 = scalar_lea.vmem %s315_s16, 256  ;;  %p317_p11 = scmp.lt.s32.totalorder %s475_s27, %s315_s16 }
  0x23   : > { %p312_p4 = pnand %p310_p2, %p296_p3  ;;  %p318_p5 = scmp.lt.s32.totalorder %s316_s20, %s309_s13 }
  0x25   : > { %p313_p12 = pneg %p312_p4  ;;  %p319_p8 = por %p318_p5, %p317_p11 }
  0x27   : > { %p320_p9 = pnand %p319_p8, %p313_p12 }
  0x29   : > { %323 = shalt.err (!%p320_p9)
}
  0x2a   : > { %251 = dma.hbm_to_vmem [thread:$0]  (!%p471_p13), %s467_s25, 128, %s475_s27, %s88_s29  }
  0x2b   : > { %p576_p0 = scmp.lt.s32.totalorder %s390_s9, 3  ;;  %p577_p1 = scmp.ge.s32.totalorder %s390_s9, 1 }
  0x2d   : > { %p104_p3 = pnand %p577_p1, %p576_p0 }
  0x2e   : > { %s509_s21 = sand.u32 (!%p104_p3), 1, %s382_s7  }
  0x2f   : > { %107 = sbr.rel (%p104_p3) target bundleno = 388 (0x184), region = 24  ;;  %s238_s22 = sshll.u32 (!%p104_p3), %s509_s21, 3 }
  0x30   : > { %s110_s23 = scalar_lea.sflag (!%p104_p3), [#allocation3], %s509_s21  ;;  %s113_s24 = scalar_lea.vmem (!%p104_p3), [#allocation2], %s238_s22 }
  0x36   : > { %369 = dma.done.wait (%p447_p6), %s110_s23, 128  }
  0x37   : > { %371 = vsyncadd (%p447_p6), %s110_s23, 4294967168  ;;  %vm133_vm0 = vcmask 261120   ;;  %v132_v0 = vld [vmem:[%s113_s24] sm:$0xff]  ;;  %s241_s17 = sshll.u32 %s425_s10, 7  ;;  %s131_s25 = scalar_lea.vmem [#allocation5], %s238_s22 }
  0x38   : > { %v134_v1 = vsel %vm133_vm0, %v132_v0, -inf  ;;  %s162_s26 = sshll.u32 %s131_s25, 4  ;;  %s523_s29 = scalar_lea.hbm %s569_s1, %s241_s17  ;;  %s525_s26 = int_to_ptr.vmem [resolvable:$true] %s162_s26 }
  0x39   : > { %135 = vmax.xlane.f32.xlu0 %v134_v1  ;;  %s149_s30 = scalar_lea.sflag [#allocation4], %s509_s21  ;;  %s324_s2 = scalar_lea.vmem %s525_s26, 128 }
  0x3a   : > { %p325_p6 = scmp.ne.s32.totalorder %s525_s26, %s324_s2  ;;  %p578_p11 = scmp.ne.s32.totalorder %s573_s18, 0 }
  0x3b   : > { %s393_s10 = smov [#allocation5]  }
  0x3c   : > { %p326_p12 = pnand %p325_p6, %p578_p11  ;;  %s328_s3 = sshll.u32 %s393_s10, 4  ;;  %s329_s3 = int_to_ptr.vmem [resolvable:$false] %s328_s3 }
  0x3d   : > { %s330_s4 = scalar_lea.vmem %s329_s3, 256  ;;  %p331_p7 = scmp.lt.s32.totalorder %s525_s26, %s329_s3 }
  0x3e   : > { %p327_p13 = pneg %p326_p12  ;;  %p332_p10 = scmp.lt.s32.totalorder %s330_s4, %s324_s2 }
  0x40   : > { %p333_p2 = por %p332_p10, %p331_p7 }
  0x42   : > { %p334_p4 = pnand %p333_p2, %p327_p13 }
  0xc6   : > { %v136_v2 = vpop.xlane.xlu0 %135 }
  0xc7   : > { %v137_v3 = vsub.f32 %v132_v0, %v136_v2 }
  0xc9   : > { %v138_v4 = vmul.f32 1.442695, %v137_v3 }
  0xcb   : > { %290 = vpow2.f32 %v138_v4 }
  0xd5   : > { %v291_v5 = vpop.eup %290 }
  0xd6   : > { %v140_v6 = vsel %vm133_vm0, %v291_v5, 0.0 }
  0xd7   : > { %141 = vadd.xlane.f32.xlu0 %v140_v6 }
 0x164   : > { %v142_v7 = vpop.xlane.xlu0 %141 }
 0x165   : > { %292 = vlog2.f32 %v142_v7 }
 0x16f   : > { %v293_v8 = vpop.eup %292 }
 0x170   : > { %v144_v9 = vmul.f32 0.6931472, %v293_v8 }
 0x172   : > { %v145_v10 = vadd.f32 %v144_v9, %v136_v2 }
 0x174   : > { %v146_v11 = vsub.f32 %v132_v0, %v145_v10 }
 0x176   : > { %147 = vst.msk [vmem:[%s131_s25] sm:$0xff] %vm133_vm0, %v146_v11 }
 0x177   : > { %337 = shalt.err (!%p334_p4)
}
 0x178   : > { %s338_s5 = scalar_lea.hbm %s523_s29, 128  ;;  %s342_s14 = scalar_lea.hbm %s569_s1, 256 }
 0x179   : > { %p339_p5 = scmp.ne.s32.totalorder %s523_s29, %s338_s5  ;;  %p343_p0 = scmp.lt.u32.totalorder %s523_s29, %s569_s1 }
 0x17a   : > { %p344_p1 = scmp.lt.u32.totalorder %s342_s14, %s338_s5  ;;  %p346_p6 = scmp.lt.u32.totalorder %s338_s5, %s523_s29 }
 0x17b   : > { %p340_p8 = pnand %p339_p5, %p578_p11 }
 0x17c   : > { %p345_p3 = por %p344_p1, %p343_p0 }
 0x17d   : > { %p341_p9 = pneg %p340_p8 }
 0x17e   : > { %p347_p12 = por %p346_p6, %p345_p3 }
 0x180   : > { %p348_p13 = pnand %p347_p12, %p341_p9 }
 0x182   : > { %351 = shalt.err (!%p348_p13)
}
 0x183   : > { %246 = dma.vmem_to_hbm [thread:$0]  (%p578_p11), %s525_s26, 128, %s523_s29, %s149_s30  }
 0x184 PF: > { %s174_s21 = sand.u32 1, %s378_s6   ;;  %p579_p7 = scmp.ne.s32.totalorder %s574_s19, 0 }
 0x185   : > { %p580_p10 = scmp.ge.s32.totalorder %s390_s9, 2  ;;  %s175_s22 = scalar_lea.sflag [#allocation4], %s174_s21 }
 0x187   : > { %p253_p2 = pnand %p580_p10, %p579_p7 }
 0x189   : > { %373 = dma.done.wait (!%p253_p2), %s175_s22, 128  }
 0x18a   : > { %375 = vsyncadd (!%p253_p2), %s175_s22, 4294967168  ;;  %p14_p4 = scmp.ge.s32.totalorder %s429_s12, 4   ;;  %s581_s6 = smov %s382_s7 }
 0x18b   : > { %s582_s7 = smov %s386_s8  ;;  %s583_s8 = smov %s441_s15 }
 0x18c   : > { %s584_s9 = smov %s429_s12  ;;  %16 = sbr.rel (!%p14_p4) target bundleno = 5 (0x5), region = 69 }
 0x193   :  { %180 = vsyncpa [#allocation3], 1 }
 0x194   :  { %182 = vsyncpa [#allocation3 + $0x1], 1 }
 0x195   :  { %183 = vsyncpa [#allocation4], 1 }
 0x196   :  { %185 = vsyncpa [#allocation4 + $0x1], 1 }

</bundles_post_ra>
